<compile_context>
chip_gen: v5e
topology: v5e:2x2
jax: 0.10.0
libtpu: 0.0.40
codegen_flags: <defaults>
</compile_context>

<pallas_src>
import functools

import jax
import jax.numpy as jnp
from jax.experimental import pallas as pl
from jax.experimental.pallas import tpu as pltpu

_MiB = 1024 * 1024


def _round_up(x, m):
    return ((x + m - 1) // m) * m


# ---------------------------------------------------------------------------
# Path A (common case): centers resident in VMEM, one-hot MXU gather.
# ---------------------------------------------------------------------------
def _center_loss_resident_kernel(label_ref, feat_ref, centers_ref, partial_ref,
                                 *, num_classes):
    """One batch tile of the center-loss forward pass.

    label_ref   : (bm, 1) int32 VMEM tile (padded rows carry -1)
    feat_ref    : (bm, D) VMEM tile (stored dtype; padded rows are 0)
    centers_ref : (C, D)  VMEM, resident across all grid steps
    partial_ref : (1, 128) f32 per-tile partial sum (lane-dense store)
    """
    f = feat_ref[...].astype(jnp.float32)
    bm = f.shape[0]
    labels = label_ref[...]                                        # (bm, 1) i32
    class_ids = jax.lax.broadcasted_iota(jnp.int32, (bm, num_classes), 1)
    # Padded rows have label -1 -> all-zero one-hot row -> zero gathered center,
    # and their features are zero-padded, so they contribute exactly 0.
    one_hot = (class_ids == labels).astype(centers_ref.dtype)       # (bm, C)
    gathered = jnp.dot(one_hot, centers_ref[...],
                       preferred_element_type=jnp.float32)          # (bm, D) f32
    diff = f - gathered
    s = jnp.sum(diff * diff)
    partial_ref[...] = jnp.full((1, 128), s, dtype=jnp.float32)


# ---------------------------------------------------------------------------
# Path B (fallback, very large C*D): centers stay in HBM, per-row DMA gather.
# ---------------------------------------------------------------------------
def _center_loss_hbm_kernel(label_ref, feat_ref, centers_hbm, partial_ref,
                            cbuf, copy_sems, *, total_rows):
    """label_ref: (B_pad,) int32 SMEM (scalar prefetch); centers_hbm in HBM."""
    tile = pl.program_id(0)
    bm, _ = feat_ref.shape
    base = tile * bm

    # DMA-gather only the bm center rows this tile references.
    copies = []
    for r in range(bm):
        cp = pltpu.make_async_copy(
            centers_hbm.at[pl.ds(label_ref[base + r], 1)],
            cbuf.at[pl.ds(r, 1)],
            copy_sems.at[r],
        )
        cp.start()
        copies.append(cp)
    # Reuse the started copy objects for the waits (no dummy-source descriptors).
    # TODO(synk): double-buffer this gather one tile ahead (labels are fully
    # prefetched in SMEM) to hide the gather latency behind the previous tile.
    for cp in copies:
        cp.wait()

    f = feat_ref[...].astype(jnp.float32)
    c = cbuf[...].astype(jnp.float32)
    diff = f - c
    sq = diff * diff
    if total_rows % bm != 0:
        # Mask padded tail rows (only relevant on the last tile).
        row = base + jax.lax.broadcasted_iota(jnp.int32, sq.shape, 0)
        sq = jnp.where(row < total_rows, sq, 0.0)
    partial_ref[...] = jnp.full((1, 128), jnp.sum(sq), dtype=jnp.float32)


def center_loss(label, feat, centers, size_average=True, block_rows=None,
                force_hbm_gather=False):
    """JAX/Pallas equivalent of CenterLoss.forward(label, feat)."""
    B = feat.shape[0]
    feat2d = feat.reshape(B, -1)
    C, D = centers.shape
    if feat2d.shape[1] != D:
        raise ValueError(
            "Center's dim: {0} should be equal to input feature's dim: {1}".format(
                D, feat2d.shape[1]))

    feat_bytes = jnp.dtype(feat2d.dtype).itemsize
    centers_bytes = jnp.dtype(centers.dtype).itemsize

    # Resident centers (worst case double-buffered by the pipeline).
    resident_bytes = 2 * C * D * centers_bytes
    use_resident = (not force_hbm_gather) and resident_bytes <= 24 * _MiB

    # --- pick the batch tile size from a VMEM budget (not a fixed 128) -------
    budget = 40 * _MiB  # conservative across v5e/v6e/v7x; raised via vmem_limit_bytes
    if block_rows is not None:
        bm = max(8, _round_up(min(int(block_rows), _round_up(B, 8)), 8))
    else:
        fixed = resident_bytes if use_resident else 0
        avail = max(budget - fixed - 4 * _MiB, 4 * _MiB)
        per_row = (2 * D * feat_bytes                # feat double buffer
                   + D * max(centers_bytes, 4)       # gathered centers / cbuf
                   + 3 * D * 4                       # f32 working temporaries
                   + (C * 4 if use_resident else 0)  # one-hot row
                   + 2 * 4)                          # label tile
        bm = int(avail // per_row)
        bm = min(bm, 2048)
        if B >= 1024:
            bm = min(bm, -(-B // 4))   # >= 4 grid steps -> both v7x TCs busy
        if not use_resident:
            bm = min(bm, 128)          # cap unrolled DMA descriptor count
        if bm >= B:
            bm = _round_up(B, 8)
        else:
            bm = max(8, (bm // 8) * 8)

    num_tiles = pl.cdiv(B, bm)
    b_pad = num_tiles * bm

    labels_i32 = label.astype(jnp.int32).reshape(B)

    # VMEM budget estimate -> explicit scoped-VMEM limit (capped for v7x).
    est_bytes = (2 * bm * D * feat_bytes
                 + 2 * bm * 4
                 + (resident_bytes if use_resident else bm * D * centers_bytes)
                 + 4 * bm * D * 4
                 + (bm * C * 4 if use_resident else 0)
                 + 2 * _MiB)
    vmem_limit = int(min(48 * _MiB, max(32 * _MiB, 2 * est_bytes)))

    if use_resident:
        # Pad labels with -1 (never matches a class id) and feat with zeros so
        # padded rows contribute exactly zero -- no mask needed in the kernel.
        if b_pad != B:
            feat2d = jnp.pad(feat2d, ((0, b_pad - B), (0, 0)))
            labels_i32 = jnp.pad(labels_i32, (0, b_pad - B), constant_values=-1)
        labels_col = labels_i32.reshape(b_pad, 1)

        kernel = functools.partial(_center_loss_resident_kernel, num_classes=C)
        partials = pl.pallas_call(
            kernel,
            out_shape=jax.ShapeDtypeStruct((num_tiles, 128), jnp.float32),
            grid_spec=pltpu.PrefetchScalarGridSpec(
                num_scalar_prefetch=0,
                grid=(num_tiles,),
                in_specs=[
                    pl.BlockSpec((bm, 1), lambda i: (i, 0)),   # label tile
                    pl.BlockSpec((bm, D), lambda i: (i, 0)),   # feat tile (pipelined)
                    pl.BlockSpec((C, D), lambda i: (0, 0)),    # resident centers
                ],
                out_specs=pl.BlockSpec((1, 128), lambda i: (i, 0)),
            ),
            compiler_params=pltpu.CompilerParams(
                dimension_semantics=("parallel",),
                vmem_limit_bytes=vmem_limit,
            ),
        )(labels_col, feat2d, centers)
    else:
        # HBM gather fallback: clamp labels so a bad label cannot become an
        # out-of-bounds HBM DMA (torch would raise instead).
        labels_i32 = jnp.clip(labels_i32, 0, C - 1)
        if b_pad != B:
            feat2d = jnp.pad(feat2d, ((0, b_pad - B), (0, 0)))
            labels_i32 = jnp.pad(labels_i32, (0, b_pad - B))  # class 0 (valid), masked

        kernel = functools.partial(_center_loss_hbm_kernel, total_rows=B)
        partials = pl.pallas_call(
            kernel,
            out_shape=jax.ShapeDtypeStruct((num_tiles, 128), jnp.float32),
            grid_spec=pltpu.PrefetchScalarGridSpec(
                num_scalar_prefetch=1,
                grid=(num_tiles,),
                in_specs=[
                    pl.BlockSpec((bm, D), lambda i, lbl: (i, 0)),  # feat tile
                    pl.BlockSpec(memory_space=pl.ANY),             # centers in HBM
                ],
                out_specs=pl.BlockSpec((1, 128), lambda i, lbl: (i, 0)),
                scratch_shapes=[
                    pltpu.VMEM((bm, D), centers.dtype),
                    pltpu.SemaphoreType.DMA((bm,)),
                ],
            ),
            compiler_params=pltpu.CompilerParams(
                dimension_semantics=("parallel",),
                vmem_limit_bytes=vmem_limit,
            ),
        )(labels_i32, feat2d, centers)

    loss = jnp.sum(partials[:, 0]) * 0.5
    if size_average:
        loss = loss / B
    return loss


def _reference(label, feat, centers, size_average=True):
    B = feat.shape[0]
    feat2d = feat.reshape(B, -1).astype(jnp.float32)
    centers_batch = centers.astype(jnp.float32)[label]
    loss = jnp.sum((feat2d - centers_batch) ** 2) / 2.0
    if size_average:
        loss = loss / B
    return loss


if __name__ == "__main__":
    num_classes = 10
    feat_dim = 32

    key = jax.random.PRNGKey(0)
    k_centers, k_feat1, k_lab1, k_feat2, k_lab2 = jax.random.split(key, 5)

    # nn.Parameter(torch.randn(num_classes, feat_dim)) -> normal init
    centers = jax.random.normal(k_centers, (num_classes, feat_dim), dtype=jnp.float32)

    # Test 1: single tile, resident-centers path, auto block size.
    batch1 = 4
    feat1 = jax.random.normal(k_feat1, (batch1, feat_dim), dtype=jnp.float32)
    label1 = jax.random.randint(k_lab1, (batch1,), 0, num_classes, dtype=jnp.int32)
    loss1 = jax.block_until_ready(center_loss(label1, feat1, centers))
    ref1 = _reference(label1, feat1, centers)
    assert jnp.allclose(loss1, ref1, rtol=1e-5, atol=1e-5), (loss1, ref1)

    # Test 2: multi-tile grid with a padded tail (B=10, bm=8 -> 2 tiles).
    batch2 = 10
    feat2 = jax.random.normal(k_feat2, (batch2, feat_dim), dtype=jnp.float32)
    label2 = jax.random.randint(k_lab2, (batch2,), 0, num_classes, dtype=jnp.int32)
    loss2 = jax.block_until_ready(center_loss(label2, feat2, centers, block_rows=8))
    ref2 = _reference(label2, feat2, centers)
    assert jnp.allclose(loss2, ref2, rtol=1e-5, atol=1e-5), (loss2, ref2)

    # Test 3: forced HBM-gather fallback path (the very-large-C*D code path).
    loss3 = jax.block_until_ready(
        center_loss(label2, feat2, centers, block_rows=8, force_hbm_gather=True))
    assert jnp.allclose(loss3, ref2, rtol=1e-5, atol=1e-5), (loss3, ref2)

    # Test 4: bf16 inputs (upcast to f32 inside the kernel).
    feat2_bf16 = feat2.astype(jnp.bfloat16)
    centers_bf16 = centers.astype(jnp.bfloat16)
    loss4 = jax.block_until_ready(center_loss(label2, feat2_bf16, centers_bf16))
    ref4 = _reference(label2, feat2_bf16, centers_bf16)
    assert jnp.allclose(loss4, ref4, rtol=1e-3, atol=1e-3), (loss4, ref4)

    print("KERNEL_OK")
</pallas_src>

<mosaic_0001>
module attributes {stable_mosaic.version = 11 : i64} {
  func.func @_center_loss_resident_kernel(%arg0: i32, %arg1: memref<8x1xi32, #tpu.memory_space<vmem>>, %arg2: memref<8x32xf32, #tpu.memory_space<vmem>>, %arg3: memref<10x32xf32, #tpu.memory_space<vmem>>, %arg4: memref<1x128xf32, #tpu.memory_space<vmem>>) attributes {dimension_semantics = [#tpu.dimension_semantics<parallel>], iteration_bounds = array<i64: 1>, scalar_prefetch = 0 : i64, scratch_operands = 0 : i64, tpu.core_type = #tpu.core_type<tc>, window_params = [{transform_indices = @transform_0, window_bounds = array<i64: 8, 1>}, {transform_indices = @transform_1, window_bounds = array<i64: 8, 32>}, {pipeline_mode = #tpu.pipeline_mode<synchronous>, transform_indices = @transform_2, window_bounds = array<i64: 10, 32>}, {transform_indices = @transform_3, window_bounds = array<i64: 1, 128>}]} {
    %c0 = arith.constant 0 : index
    %c0_0 = arith.constant 0 : index
    %0 = vector.load %arg2[%c0, %c0_0] : memref<8x32xf32, #tpu.memory_space<vmem>>, vector<8x32xf32>
    %c0_1 = arith.constant 0 : index
    %c0_2 = arith.constant 0 : index
    %1 = vector.load %arg1[%c0_1, %c0_2] : memref<8x1xi32, #tpu.memory_space<vmem>>, vector<8x1xi32>
    %2 = tpu.iota {dimensions = array<i32: 1>} : vector<8x10xi32>
    %3 = vector.broadcast %1 : vector<8x1xi32> to vector<8x10xi32>
    %4 = arith.cmpi eq, %2, %3 : vector<8x10xi32>
    %5 = arith.extui %4 : vector<8x10xi1> to vector<8x10xi32>
    %6 = arith.sitofp %5 : vector<8x10xi32> to vector<8x10xf32>
    %c0_3 = arith.constant 0 : index
    %c0_4 = arith.constant 0 : index
    %7 = vector.load %arg3[%c0_3, %c0_4] : memref<10x32xf32, #tpu.memory_space<vmem>>, vector<10x32xf32>
    %cst = arith.constant dense<0.000000e+00> : vector<8x32xf32>
    %8 = tpu.matmul %6, %7, %cst {dimension_numbers = #tpu.dot_dimension_numbers<[1], [0], [0], [1], [0, 0, 1, 1], [], []>} : vector<8x10xf32>, vector<10x32xf32>, vector<8x32xf32> -> vector<8x32xf32>
    %9 = arith.subf %0, %8 : vector<8x32xf32>
    %10 = arith.mulf %9, %9 : vector<8x32xf32>
    %11 = vector.shape_cast %10 : vector<8x32xf32> to vector<1x8x32xf32>
    %cst_5 = arith.constant dense<0.000000e+00> : vector<1xf32>
    %12 = vector.multi_reduction <add>, %11, %cst_5 [1, 2] : vector<1x8x32xf32> to vector<1xf32>
    %13 = vector.shape_cast %12 : vector<1xf32> to vector<1x1x1xf32>
    %14 = vector.extract %13[0, 0, 0] : f32 from vector<1x1x1xf32>
    %15 = vector.broadcast %14 : f32 to vector<1x128xf32>
    %c0_6 = arith.constant 0 : index
    %c0_7 = arith.constant 0 : index
    %16 = vector.load %arg4[%c0_6, %c0_7] : memref<1x128xf32, #tpu.memory_space<vmem>>, vector<1x128xf32>
    tpu.vector_store %arg4[%c0_6, %c0_7], %15 {strides = array<i32>} : memref<1x128xf32, #tpu.memory_space<vmem>>, vector<1x128xf32>,
    return
  }
  func.func @transform_0(%arg0: i32) -> (i32, i32) {
    %c0_i32 = arith.constant 0 : i32
    %c0_i32_0 = arith.constant 0 : i32
    return %arg0, %c0_i32 : i32, i32
  }
  func.func @transform_1(%arg0: i32) -> (i32, i32) {
    %c0_i32 = arith.constant 0 : i32
    %c0_i32_0 = arith.constant 0 : i32
    return %arg0, %c0_i32 : i32, i32
  }
  func.func @transform_2(%arg0: i32) -> (i32, i32) {
    %c0_i32 = arith.constant 0 : i32
    %c0_i32_0 = arith.constant 0 : i32
    %c0_i32_1 = arith.constant 0 : i32
    return %c0_i32, %c0_i32_0 : i32, i32
  }
  func.func @transform_3(%arg0: i32) -> (i32, i32) {
    %c0_i32 = arith.constant 0 : i32
    %c0_i32_0 = arith.constant 0 : i32
    return %arg0, %c0_i32 : i32, i32
  }
}

</mosaic_0001>

<bundles_post_ra>
// kernel: tpu_custom_call.1
= control target key start
LH: loop header
LB: loop body
LE: loop exit
PB: predicated region body
PF: predicated region fallthrough
CT: control target
= control target key end

     0   :  { %8 = vsyncpa [#allocation3], 0  ;;  %s205_s0 = inlined_call_operand.vmem [shape: s32[8,1], index: 0, kind: input, shape index: {}]   ;;  %s206_s1 = inlined_call_operand.vmem [shape: f32[8,32], index: 1, kind: input, shape index: {}]   ;;  %s207_s2 = inlined_call_operand.hbm [shape: f32[10,32], index: 2, kind: input, shape index: {}]   ;;  %s208_s3 = inlined_call_operand.hbm [shape: f32[1,128], index: 3, kind: output, shape index: {}]  }
   0x1   :  { %9 = vsyncpa [#allocation4], 0  ;;  %s18_s14 = sshll.u32 %s207_s2, 4  ;;  %s167_s15 = smov [#allocation2]   ;;  %s19_s14 = int_to_ptr.hbm [resolvable:$true] %s18_s14 }
   0x2   :  { %s20_s16 = sshll.u32 %s167_s15, 4  ;;  %s168_s17 = smov 128   ;;  %s21_s16 = int_to_ptr.vmem [resolvable:$true] %s20_s16 }
   0x3   :  { %s169_s18 = smov 8  }
   0x4   :  { %26 = dma.hbm_to_vmem [thread:$0]  %s19_s14, 256, %s21_s16, [#allocation3], %s168_s17, %s168_s17, %s169_s18  }
   0x5   :  { %163 = dma.done.wait [#allocation3], 256  }
   0x6   :  { %164 = vsyncadd [#allocation3], 4294967040  ;;  %v170_v0 = vmov 0   ;;  %vm47_vm0 = vcmask 1041408   ;;  %v32_v1 = vld [vmem:[%s205_s0] sm:$0xff]  ;;  %v33_v4 = vlaneseq  ;;  %vm43_vm1 = vcmask 80896  }
   0x7   :  { %114 = vset.pattern.permute.xlu0 %v170_v0  ;;  %v42_v2 = vld [vmem:[#allocation2 + $0x8] sm:$0x3]  ;;  %v41_v3 = vld [vmem:[#allocation2] sm:$0xff]  ;;  %v171_v7 = vmov 0.0   ;;  %vm73_vm3 = vcmask 261120   ;;  %s172_s0 = smov [#allocation5]  }
   0x8   :  { %36 = vperm.xlu0 %114, %v32_v1   ;;  %104 = vmatpush.msk.msra.mxu0 %vm47_vm0, %v42_v2  ;;  %v34_v5 = vand.u32 127, %v33_v4  ;;  %v31_v9 = vld [vmem:[%s206_s1] sm:$0xff]  ;;  %s91_s22 = sshll.u32 %s172_s0, 4  ;;  %s93_s1 = sshll.u32 %s208_s3, 4  ;;  %s92_s22 = int_to_ptr.vmem [resolvable:$true] %s91_s22  ;;  %s94_s1 = int_to_ptr.hbm [resolvable:$true] %s93_s1 }
   0xa   :  { %66 = vmatpush.msra.mxu0 %v41_v3 }
  0x7a   :  { %v37_v6 = vpop.permute.xlu0 %36 }
  0x7b   :  { %vm38_vm2 = vcmp.eq.s32.totalorder %v34_v5, %v37_v6 }
  0x7c   :  { %v103_v8 = vsel %vm38_vm2, 1.0, %v171_v7 }
  0x7d   :  { %105 = vmatmul.msk.f32.vlgmr.msra.gmra.mxu0 %vm43_vm1, %v103_v8 }
  0xfa   :  { %v68_v10 = vpop.f32.mrf.mxu0 }
  0xfb   :  { %v71_v11 = vsub.f32 %v31_v9, %v68_v10 }
  0xfd   :  { %v72_v12 = vmul.f32 %v71_v11, %v71_v11 }
  0xff   :  { %v74_v13 = vsel %vm73_vm3, %v72_v12, 0.0 }
 0x100   :  { %75 = vadd.xlane.f32.xlu0 %v74_v13 }
 0x173   :  { %v76_v14 = vpop.xlane.xlu0 %75 }
 0x174   :  { %v77_v15 = vrot.slane %v76_v14, 4 }
 0x176   :  { %v78_v16 = vadd.f32 %v77_v15, %v76_v14 }
 0x178   :  { %v79_v17 = vrot.slane %v78_v16, 2 }
 0x17a   :  { %v80_v18 = vadd.f32 %v79_v17, %v78_v16 }
 0x17c   :  { %v81_v19 = vrot.slane %v80_v18, 1 }
 0x17e   :  { %v82_v20 = vadd.f32 %v81_v19, %v80_v18 }
 0x180   :  { %106 = vpush %v82_v20 }
 0x1b1   :  { %s107_s25 = spop %106 }
 0x1b2   :  { %v84_v21 = vstv %s107_s25 }
 0x1b3   :  { %85 = vst [vmem:[#allocation5] sm:$0x1] %v84_v21 }
 0x1b4   :  { %96 = dma.vmem_to_hbm [thread:$0]  %s92_s22, 16, %s94_s1, [#allocation4]  }
 0x1b5   :  { %165 = dma.done.wait [#allocation4], 16  }
 0x1b6   :  { %166 = vsyncadd [#allocation4], 4294967280 }
 0x1b7   :  { %101 = vsyncpa [#allocation3], 1 }
 0x1b8   :  { %102 = vsyncpa [#allocation4], 1 }

</bundles_post_ra>
